<compile_context>
chip_gen: v5e
topology: v5e:2x2
jax: 0.10.0
libtpu: 0.0.40
codegen_flags: <defaults>
</compile_context>

<pallas_src>
import jax
import jax.numpy as jnp
from jax.experimental import pallas as pl
from jax.experimental.pallas import tpu as pltpu

BN_EPS = 1e-3   # matches nn.BatchNorm1d(..., eps=0.001)
LANE = 128
SUBLANE = 8
MAX_TILE_N = 512  # rows per grid step; biggest tile that comfortably fits VMEM


def _round_up(x, m):
    return (x + m - 1) // m * m


def _pad2(x, rows, cols):
    """Zero-pad a 2-D array up to (rows, cols); no copy if already that shape."""
    if x.shape == (rows, cols):
        return x
    return jnp.zeros((rows, cols), x.dtype).at[: x.shape[0], : x.shape[1]].set(x)


# ----------------------------- fused Pallas kernel -------------------------- #

def _make_fused_decoder_kernel(n_hidden_layers, out_type, true_out):
    """Build kernel(z_ref, w0, b0, ..., wx, bx, o_ref) for a fixed architecture.

    All hidden layers are (BN-folded) Linear + ReLU; the last (w, b) pair is
    decoder_x followed by the Type-dependent output nonlinearity.  Intermediates
    live in vregs/VMEM only — nothing goes back to HBM until the final store.
    """
    def kernel(*refs):
        z_ref, o_ref = refs[0], refs[-1]
        wb = refs[1:-1]

        h = z_ref[...]
        for i in range(n_hidden_layers):
            w = wb[2 * i][...]
            b = wb[2 * i + 1][...]
            h = jnp.maximum(
                jnp.dot(h, w, preferred_element_type=jnp.float32) + b, 0.0)

        wx = wb[2 * n_hidden_layers][...]
        bx = wb[2 * n_hidden_layers + 1][...]
        logits = jnp.dot(h, wx, preferred_element_type=jnp.float32) + bx

        if out_type in ("Bernoulli", "Gaussian"):
            out = jax.nn.sigmoid(logits)
        elif out_type == "Gaussian1":
            # softmax over the real (unpadded) output columns only
            lane = jax.lax.broadcasted_iota(jnp.int32, logits.shape, 1)
            valid = lane < true_out
            masked = jnp.where(valid, logits, -1e30)
            m = jnp.max(masked, axis=-1, keepdims=True)
            e = jnp.where(valid, jnp.exp(masked - m), 0.0)
            out = e * pl.reciprocal(jnp.sum(e, axis=-1, keepdims=True), approx=False)
        elif out_type == "Gaussian2":
            out = jnp.maximum(logits, 0.0)
        else:
            out = logits
        o_ref[...] = out.astype(o_ref.dtype)

    return kernel


# --------------------------- parameter construction ------------------------- #

def _init_linear(key, n_in, n_out):
    """Deterministic init mirroring PyTorch nn.Linear default (uniform +/- 1/sqrt(in))."""
    kw, kb = jax.random.split(key)
    bound = 1.0 / jnp.sqrt(jnp.float32(n_in))
    w = jax.random.uniform(kw, (n_in, n_out), jnp.float32, -bound, bound)  # (in, out)
    b = jax.random.uniform(kb, (n_out,), jnp.float32, -bound, bound)
    return w, b


def init_decoder_params(key, layer, hidden, input_size):
    """Raw (un-folded, un-padded) parameters mirroring the PyTorch module."""
    params = {"layer": tuple(layer), "fc": []}
    n_hidden = len(layer) - 1 if len(layer) > 1 else 0
    keys = jax.random.split(key, n_hidden + 1)
    if len(layer) > 1:
        for i, (n_in, n_out) in enumerate(zip(layer[:-1], layer[1:])):
            w, b = _init_linear(keys[i], n_in, n_out)
            params["fc"].append({
                "w": w, "b": b,
                "gamma": jnp.ones((n_out,), jnp.float32),
                "beta": jnp.zeros((n_out,), jnp.float32),
                "running_mean": jnp.zeros((n_out,), jnp.float32),
                "running_var": jnp.ones((n_out,), jnp.float32),
            })
    params["decoder_x"] = _init_linear(keys[-1], hidden, input_size)
    return params


def prepare_decoder_params(params):
    """Fold BatchNorm(eval) into the Linear weights and zero-pad every feature
    dimension up to a multiple of 128 (lane-dense matmuls & stores).

    Returns a list of (W_padded (in_p, out_p), b_padded (1, out_p)) per layer,
    the last entry being decoder_x.
    """
    folded = []
    for lp in params["fc"]:
        scale = lp["gamma"] * jax.lax.rsqrt(lp["running_var"] + BN_EPS)
        w = lp["w"] * scale[None, :]
        b = (lp["b"] - lp["running_mean"]) * scale + lp["beta"]
        folded.append((w, b))
    folded.append(params["decoder_x"])

    padded = []
    for w, b in folded:
        n_in, n_out = w.shape
        in_p, out_p = _round_up(n_in, LANE), _round_up(n_out, LANE)
        wp = _pad2(w, in_p, out_p)
        bp = _pad2(b.reshape(1, n_out), 1, out_p)
        padded.append((wp, bp))
    return padded


# ------------------------------ forward pass -------------------------------- #

def decoder_forward(prepared, z, input_size, out_type="Bernoulli"):
    """Equivalent of Decoder.forward(z) (eval mode) via a single fused pallas_call."""
    n, z_dim = z.shape
    in_p = prepared[0][0].shape[0]
    out_p = prepared[-1][0].shape[1]

    # Batch tiling: sublane-aligned tiles, gridded & marked parallel (megacore).
    tile_n = min(MAX_TILE_N, _round_up(n, SUBLANE))
    n_p = _round_up(n, tile_n)

    zp = _pad2(z, n_p, in_p)

    n_hidden = len(prepared) - 1
    kernel = _make_fused_decoder_kernel(n_hidden, out_type, input_size)

    in_specs = [pl.BlockSpec((tile_n, in_p), lambda i: (i, 0))]
    args = [zp]
    for w, b in prepared:
        # Constant index maps -> weights/biases stay resident across grid steps.
        in_specs.append(pl.BlockSpec(w.shape, lambda i: (0, 0)))
        in_specs.append(pl.BlockSpec(b.shape, lambda i: (0, 0)))
        args.extend([w, b])

    out = pl.pallas_call(
        kernel,
        out_shape=jax.ShapeDtypeStruct((n_p, out_p), jnp.float32),
        grid=(n_p // tile_n,),
        in_specs=in_specs,
        out_specs=pl.BlockSpec((tile_n, out_p), lambda i: (i, 0)),
        compiler_params=pltpu.CompilerParams(
            dimension_semantics=("parallel",)),
    )(*args)

    return out[:n, :input_size]

    # TODO(synk): for very large layer widths the resident-weight design should
    # switch to a K/N-tiled grid with a VMEM accumulator and bf16 operands
    # (v6e/v7x MXU path); unnecessary at DCCA-scale layer sizes.


def decoder_forward_reference(params, z, out_type="Bernoulli"):
    """Pure-JAX reference (un-folded BN, un-padded) for correctness checking."""
    h = z
    if len(params["layer"]) > 1:
        for lp in params["fc"]:
            y = h @ lp["w"] + lp["b"]
            y = (y - lp["running_mean"]) * jax.lax.rsqrt(lp["running_var"] + BN_EPS)
            y = y * lp["gamma"] + lp["beta"]
            h = jnp.maximum(y, 0.0)
    wx, bx = params["decoder_x"]
    recon = h @ wx + bx
    if out_type in ("Bernoulli", "Gaussian"):
        return jax.nn.sigmoid(recon)
    if out_type == "Gaussian1":
        return jax.nn.softmax(recon, axis=1)
    if out_type == "Gaussian2":
        return jnp.maximum(recon, 0.0)
    return recon


# ----------------------------------- main ------------------------------------ #

if __name__ == "__main__":
    key = jax.random.PRNGKey(0)
    k_z, k_p = jax.random.split(key)

    # Decoder(layer=[16, 32, 64], hidden=64, input_size=100, Type='Bernoulli')
    layer = [16, 32, 64]
    hidden = 64
    input_size = 100
    batch = 8

    z = jax.random.normal(k_z, (batch, layer[0]), jnp.float32)
    params = init_decoder_params(k_p, layer, hidden, input_size)
    prepared = prepare_decoder_params(params)

    # Primary path: Type='Bernoulli' (sigmoid output)
    final_x = decoder_forward(prepared, z, input_size, "Bernoulli")
    final_x = jax.block_until_ready(final_x)
    ref = decoder_forward_reference(params, z, "Bernoulli")
    assert final_x.shape == (batch, input_size)
    assert jnp.allclose(final_x, ref, atol=1e-5, rtol=1e-5), "Bernoulli mismatch"

    # Also exercise the masked-softmax path: Type='Gaussian1'
    final_sm = decoder_forward(prepared, z, input_size, "Gaussian1")
    final_sm = jax.block_until_ready(final_sm)
    ref_sm = decoder_forward_reference(params, z, "Gaussian1")
    assert jnp.allclose(final_sm, ref_sm, atol=1e-5, rtol=1e-5), "Gaussian1 mismatch"

    print("KERNEL_OK")
</pallas_src>

<mosaic_0001>
module attributes {stable_mosaic.version = 11 : i64} {
  func.func @kernel(%arg0: i32, %arg1: memref<8x128xf32, #tpu.memory_space<vmem>>, %arg2: memref<128x128xf32, #tpu.memory_space<vmem>>, %arg3: memref<1x128xf32, #tpu.memory_space<vmem>>, %arg4: memref<128x128xf32, #tpu.memory_space<vmem>>, %arg5: memref<1x128xf32, #tpu.memory_space<vmem>>, %arg6: memref<128x128xf32, #tpu.memory_space<vmem>>, %arg7: memref<1x128xf32, #tpu.memory_space<vmem>>, %arg8: memref<8x128xf32, #tpu.memory_space<vmem>>) attributes {dimension_semantics = [#tpu.dimension_semantics<parallel>], iteration_bounds = array<i64: 1>, scalar_prefetch = 0 : i64, scratch_operands = 0 : i64, tpu.core_type = #tpu.core_type<tc>, window_params = [{transform_indices = @transform_0, window_bounds = array<i64: 8, 128>}, {pipeline_mode = #tpu.pipeline_mode<synchronous>, transform_indices = @transform_1, window_bounds = array<i64: 128, 128>}, {pipeline_mode = #tpu.pipeline_mode<synchronous>, transform_indices = @transform_2, window_bounds = array<i64: 1, 128>}, {pipeline_mode = #tpu.pipeline_mode<synchronous>, transform_indices = @transform_3, window_bounds = array<i64: 128, 128>}, {pipeline_mode = #tpu.pipeline_mode<synchronous>, transform_indices = @transform_4, window_bounds = array<i64: 1, 128>}, {pipeline_mode = #tpu.pipeline_mode<synchronous>, transform_indices = @transform_5, window_bounds = array<i64: 128, 128>}, {pipeline_mode = #tpu.pipeline_mode<synchronous>, transform_indices = @transform_6, window_bounds = array<i64: 1, 128>}, {transform_indices = @transform_7, window_bounds = array<i64: 8, 128>}]} {
    %c0 = arith.constant 0 : index
    %c0_0 = arith.constant 0 : index
    %0 = vector.load %arg1[%c0, %c0_0] : memref<8x128xf32, #tpu.memory_space<vmem>>, vector<8x128xf32>
    %c0_1 = arith.constant 0 : index
    %c0_2 = arith.constant 0 : index
    %1 = vector.load %arg2[%c0_1, %c0_2] : memref<128x128xf32, #tpu.memory_space<vmem>>, vector<128x128xf32>
    %c0_3 = arith.constant 0 : index
    %c0_4 = arith.constant 0 : index
    %2 = vector.load %arg3[%c0_3, %c0_4] : memref<1x128xf32, #tpu.memory_space<vmem>>, vector<1x128xf32>
    %cst = arith.constant dense<0.000000e+00> : vector<8x128xf32>
    %3 = tpu.matmul %0, %1, %cst {dimension_numbers = #tpu.dot_dimension_numbers<[1], [0], [0], [1], [0, 0, 1, 1], [], []>} : vector<8x128xf32>, vector<128x128xf32>, vector<8x128xf32> -> vector<8x128xf32>
    %4 = vector.broadcast %2 : vector<1x128xf32> to vector<8x128xf32>
    %5 = arith.addf %3, %4 : vector<8x128xf32>
    %cst_5 = arith.constant 0.000000e+00 : f32
    %6 = vector.broadcast %cst_5 : f32 to vector<8x128xf32>
    %7 = arith.maximumf %5, %6 : vector<8x128xf32>
    %c0_6 = arith.constant 0 : index
    %c0_7 = arith.constant 0 : index
    %8 = vector.load %arg4[%c0_6, %c0_7] : memref<128x128xf32, #tpu.memory_space<vmem>>, vector<128x128xf32>
    %c0_8 = arith.constant 0 : index
    %c0_9 = arith.constant 0 : index
    %9 = vector.load %arg5[%c0_8, %c0_9] : memref<1x128xf32, #tpu.memory_space<vmem>>, vector<1x128xf32>
    %cst_10 = arith.constant dense<0.000000e+00> : vector<8x128xf32>
    %10 = tpu.matmul %7, %8, %cst_10 {dimension_numbers = #tpu.dot_dimension_numbers<[1], [0], [0], [1], [0, 0, 1, 1], [], []>} : vector<8x128xf32>, vector<128x128xf32>, vector<8x128xf32> -> vector<8x128xf32>
    %11 = vector.broadcast %9 : vector<1x128xf32> to vector<8x128xf32>
    %12 = arith.addf %10, %11 : vector<8x128xf32>
    %cst_11 = arith.constant 0.000000e+00 : f32
    %13 = vector.broadcast %cst_11 : f32 to vector<8x128xf32>
    %14 = arith.maximumf %12, %13 : vector<8x128xf32>
    %c0_12 = arith.constant 0 : index
    %c0_13 = arith.constant 0 : index
    %15 = vector.load %arg6[%c0_12, %c0_13] : memref<128x128xf32, #tpu.memory_space<vmem>>, vector<128x128xf32>
    %c0_14 = arith.constant 0 : index
    %c0_15 = arith.constant 0 : index
    %16 = vector.load %arg7[%c0_14, %c0_15] : memref<1x128xf32, #tpu.memory_space<vmem>>, vector<1x128xf32>
    %cst_16 = arith.constant dense<0.000000e+00> : vector<8x128xf32>
    %17 = tpu.matmul %14, %15, %cst_16 {dimension_numbers = #tpu.dot_dimension_numbers<[1], [0], [0], [1], [0, 0, 1, 1], [], []>} : vector<8x128xf32>, vector<128x128xf32>, vector<8x128xf32> -> vector<8x128xf32>
    %18 = vector.broadcast %16 : vector<1x128xf32> to vector<8x128xf32>
    %19 = arith.addf %17, %18 : vector<8x128xf32>
    %20 = arith.negf %19 : vector<8x128xf32>
    %21 = math.exp %20 : vector<8x128xf32>
    %cst_17 = arith.constant 1.000000e+00 : f32
    %22 = vector.broadcast %cst_17 : f32 to vector<8x128xf32>
    %23 = arith.addf %22, %21 : vector<8x128xf32>
    %24 = arith.divf %22, %23 : vector<8x128xf32>
    %c0_18 = arith.constant 0 : index
    %c0_19 = arith.constant 0 : index
    %25 = vector.load %arg8[%c0_18, %c0_19] : memref<8x128xf32, #tpu.memory_space<vmem>>, vector<8x128xf32>
    tpu.vector_store %arg8[%c0_18, %c0_19], %24 {strides = array<i32>} : memref<8x128xf32, #tpu.memory_space<vmem>>, vector<8x128xf32>,
    return
  }
  func.func @transform_0(%arg0: i32) -> (i32, i32) {
    %c0_i32 = arith.constant 0 : i32
    %c0_i32_0 = arith.constant 0 : i32
    return %arg0, %c0_i32 : i32, i32
  }
  func.func @transform_1(%arg0: i32) -> (i32, i32) {
    %c0_i32 = arith.constant 0 : i32
    %c0_i32_0 = arith.constant 0 : i32
    %c0_i32_1 = arith.constant 0 : i32
    return %c0_i32, %c0_i32_0 : i32, i32
  }
  func.func @transform_2(%arg0: i32) -> (i32, i32) {
    %c0_i32 = arith.constant 0 : i32
    %c0_i32_0 = arith.constant 0 : i32
    %c0_i32_1 = arith.constant 0 : i32
    return %c0_i32, %c0_i32_0 : i32, i32
  }
  func.func @transform_3(%arg0: i32) -> (i32, i32) {
    %c0_i32 = arith.constant 0 : i32
    %c0_i32_0 = arith.constant 0 : i32
    %c0_i32_1 = arith.constant 0 : i32
    return %c0_i32, %c0_i32_0 : i32, i32
  }
  func.func @transform_4(%arg0: i32) -> (i32, i32) {
    %c0_i32 = arith.constant 0 : i32
    %c0_i32_0 = arith.constant 0 : i32
    %c0_i32_1 = arith.constant 0 : i32
    return %c0_i32, %c0_i32_0 : i32, i32
  }
  func.func @transform_5(%arg0: i32) -> (i32, i32) {
    %c0_i32 = arith.constant 0 : i32
    %c0_i32_0 = arith.constant 0 : i32
    %c0_i32_1 = arith.constant 0 : i32
    return %c0_i32, %c0_i32_0 : i32, i32
  }
  func.func @transform_6(%arg0: i32) -> (i32, i32) {
    %c0_i32 = arith.constant 0 : i32
    %c0_i32_0 = arith.constant 0 : i32
    %c0_i32_1 = arith.constant 0 : i32
    return %c0_i32, %c0_i32_0 : i32, i32
  }
  func.func @transform_7(%arg0: i32) -> (i32, i32) {
    %c0_i32 = arith.constant 0 : i32
    %c0_i32_0 = arith.constant 0 : i32
    return %arg0, %c0_i32 : i32, i32
  }
}

</mosaic_0001>

<bundles_post_ra>
// kernel: tpu_custom_call.1
= control target key start
LH: loop header
LB: loop body
LE: loop exit
PB: predicated region body
PF: predicated region fallthrough
CT: control target
= control target key end

     0   :  { %12 = vsyncpa [#allocation3], 0  ;;  %s464_s0 = inlined_call_operand.hbm [shape: f32[8,128], index: 0, kind: input, shape index: {}]   ;;  %s465_s1 = inlined_call_operand.hbm [shape: f32[128,128], index: 1, kind: input, shape index: {}]   ;;  %s466_s2 = inlined_call_operand.vmem [shape: f32[1,128], index: 2, kind: input, shape index: {}]   ;;  %s467_s3 = inlined_call_operand.hbm [shape: f32[128,128], index: 3, kind: input, shape index: {}]   ;;  %s468_s4 = inlined_call_operand.vmem [shape: f32[1,128], index: 4, kind: input, shape index: {}]   ;;  %s469_s5 = inlined_call_operand.hbm [shape: f32[128,128], index: 5, kind: input, shape index: {}]   ;;  %s470_s6 = inlined_call_operand.vmem [shape: f32[1,128], index: 6, kind: input, shape index: {}]   ;;  %s471_s7 = inlined_call_operand.hbm [shape: f32[8,128], index: 7, kind: output, shape index: {}]  }
   0x1   :  { %13 = vsyncpa [#allocation6], 0 }
   0x2   :  { %14 = vsyncpa [#allocation9], 0  ;;  %s31_s26 = sshll.u32 %s465_s1, 4  ;;  %s32_s26 = int_to_ptr.hbm [resolvable:$true] %s31_s26 }
   0x3   :  { %15 = vsyncpa [#allocation4], 0  ;;  %s393_s27 = smov [#allocation5]   ;;  %s21_s8 = sshll.u32 %s464_s0, 4  ;;  %s22_s8 = int_to_ptr.hbm [resolvable:$true] %s21_s8 }
   0x4   :  { %s33_s28 = sshll.u32 %s393_s27, 4  ;;  %s394_s9 = smov 128   ;;  %s34_s28 = int_to_ptr.vmem [resolvable:$true] %s33_s28 }
   0x5   :  { %s395_s10 = smov 8   ;;  %s396_s11 = smov [#allocation2]  }
   0x6   :  { %39 = dma.hbm_to_vmem [thread:$0]  %s32_s26, 2048, %s34_s28, [#allocation6], %s394_s9, %s394_s9, %s395_s10  }
   0x7   :  { %s23_s12 = sshll.u32 %s396_s11, 4  ;;  %s46_s15 = sshll.u32 %s467_s3, 4  ;;  %s24_s12 = int_to_ptr.vmem [resolvable:$true] %s23_s12  ;;  %s47_s15 = int_to_ptr.hbm [resolvable:$true] %s46_s15 }
   0x8   :  { %26 = dma.hbm_to_vmem [thread:$0]  %s22_s8, 128, %s24_s12, [#allocation3]  }
   0x9   :  { %s61_s17 = sshll.u32 %s469_s5, 4  ;;  %s397_s18 = smov [#allocation7]   ;;  %s62_s17 = int_to_ptr.hbm [resolvable:$true] %s61_s17 }
   0xa   :  { %s48_s19 = sshll.u32 %s397_s18, 4  ;;  %s398_s0 = smov [#allocation8]   ;;  %s49_s19 = int_to_ptr.vmem [resolvable:$true] %s48_s19 }
   0xb   :  { %54 = dma.hbm_to_vmem [thread:$0]  %s47_s15, 2048, %s49_s19, [#allocation6], %s394_s9, %s394_s9, %s395_s10  }
   0xc   :  { %s63_s20 = sshll.u32 %s398_s0, 4  ;;  %s64_s20 = int_to_ptr.vmem [resolvable:$true] %s63_s20 }
   0xd   :  { %69 = dma.hbm_to_vmem [thread:$0]  %s62_s17, 2048, %s64_s20, [#allocation9], %s394_s9, %s394_s9, %s395_s10  }
   0xe   :  { %385 = dma.done.wait [#allocation3], 128  }
   0xf   :  { %386 = vsyncadd [#allocation3], 4294967168 }
  0x10   :  { %387 = dma.done.wait [#allocation6], 4096  }
  0x11   :  { %388 = vsyncadd [#allocation6], 4294963200 }
  0x12   :  { %389 = dma.done.wait [#allocation9], 2048  }
  0x13   :  { %390 = vsyncadd [#allocation9], 4294965248  ;;  %v104_v0 = vld [vmem:[#allocation5 + $0x78] sm:$0xff]  ;;  %v103_v1 = vld [vmem:[#allocation5 + $0x70] sm:$0xff] }
  0x14   :  { %109 = vmatpush.msra.mxu0 %v104_v0  ;;  %v102_v2 = vld [vmem:[#allocation5 + $0x68] sm:$0xff]  ;;  %v101_v3 = vld [vmem:[#allocation5 + $0x60] sm:$0xff]  ;;  %v145_v4 = vld [vmem:[#allocation7 + $0x78] sm:$0xff] }
  0x15   :  { %v100_v5 = vld [vmem:[#allocation5 + $0x58] sm:$0xff]  ;;  %150 = vmatpush.msra.mxu1 %v145_v4  ;;  %v144_v6 = vld [vmem:[#allocation7 + $0x70] sm:$0xff]  ;;  %v143_v7 = vld [vmem:[#allocation7 + $0x68] sm:$0xff] }
  0x16   :  { %110 = vmatpush.msra.mxu0 %v103_v1  ;;  %v99_v8 = vld [vmem:[#allocation5 + $0x50] sm:$0xff]  ;;  %v142_v9 = vld [vmem:[#allocation7 + $0x60] sm:$0xff]  ;;  %v98_v10 = vld [vmem:[#allocation5 + $0x48] sm:$0xff] }
  0x17   :  { %151 = vmatpush.msra.mxu1 %v144_v6  ;;  %v141_v11 = vld [vmem:[#allocation7 + $0x58] sm:$0xff]  ;;  %v97_v12 = vld [vmem:[#allocation5 + $0x40] sm:$0xff]  ;;  %v140_v13 = vld [vmem:[#allocation7 + $0x50] sm:$0xff] }
  0x18   :  { %111 = vmatpush.msra.mxu0 %v102_v2  ;;  %v96_v14 = vld [vmem:[#allocation5 + $0x38] sm:$0xff]  ;;  %v139_v15 = vld [vmem:[#allocation7 + $0x48] sm:$0xff]  ;;  %v95_v16 = vld [vmem:[#allocation5 + $0x30] sm:$0xff] }
  0x19   :  { %152 = vmatpush.msra.mxu1 %v143_v7  ;;  %v138_v17 = vld [vmem:[#allocation7 + $0x40] sm:$0xff]  ;;  %v94_v18 = vld [vmem:[#allocation5 + $0x28] sm:$0xff]  ;;  %v137_v19 = vld [vmem:[#allocation7 + $0x38] sm:$0xff] }
  0x1a   :  { %112 = vmatpush.msra.mxu0 %v101_v3  ;;  %v93_v20 = vld [vmem:[#allocation5 + $0x20] sm:$0xff]  ;;  %v136_v21 = vld [vmem:[#allocation7 + $0x30] sm:$0xff]  ;;  %v92_v22 = vld [vmem:[#allocation5 + $0x18] sm:$0xff] }
  0x1b   :  { %153 = vmatpush.msra.mxu1 %v142_v9  ;;  %v135_v23 = vld [vmem:[#allocation7 + $0x28] sm:$0xff]  ;;  %v91_v24 = vld [vmem:[#allocation5 + $0x10] sm:$0xff]  ;;  %v134_v25 = vld [vmem:[#allocation7 + $0x20] sm:$0xff] }
  0x1c   :  { %113 = vmatpush.msra.mxu0 %v100_v5  ;;  %v90_v26 = vld [vmem:[#allocation5 + $0x8] sm:$0xff]  ;;  %v133_v27 = vld [vmem:[#allocation7 + $0x18] sm:$0xff]  ;;  %v89_v28 = vld [vmem:[#allocation5] sm:$0xff] }
  0x1d   :  { %154 = vmatpush.msra.mxu1 %v141_v11  ;;  %v88_v29 = vld [vmem:[#allocation2] sm:$0xff]  ;;  %v132_v30 = vld [vmem:[#allocation7 + $0x10] sm:$0xff]  ;;  %v131_v31 = vld [vmem:[#allocation7 + $0x8] sm:$0xff] }
  0x1e   :  { %114 = vmatpush.msra.mxu0 %v99_v8  ;;  %v130_v32 = vld [vmem:[#allocation7] sm:$0xff]  ;;  %v186_v33 = vld [vmem:[#allocation8 + $0x78] sm:$0xff]  ;;  %v185_v34 = vld [vmem:[#allocation8 + $0x70] sm:$0xff] }
  0x1f   :  { %155 = vmatpush.msra.mxu1 %v140_v13  ;;  %191 = vmatpush.msra.mxu2 %v186_v33  ;;  %v184_v35 = vld [vmem:[#allocation8 + $0x68] sm:$0xff]  ;;  %v183_v36 = vld [vmem:[#allocation8 + $0x60] sm:$0xff]  ;;  %v182_v37 = vld [vmem:[#allocation8 + $0x58] sm:$0xff] }
  0x20   :  { %115 = vmatpush.msra.mxu0 %v98_v10  ;;  %v181_v38 = vld [vmem:[#allocation8 + $0x50] sm:$0xff]  ;;  %v180_v39 = vld [vmem:[#allocation8 + $0x48] sm:$0xff]  ;;  %v179_v40 = vld [vmem:[#allocation8 + $0x40] sm:$0xff] }
  0x21   :  { %156 = vmatpush.msra.mxu1 %v139_v15  ;;  %192 = vmatpush.msra.mxu2 %v185_v34  ;;  %v178_v41 = vld [vmem:[#allocation8 + $0x38] sm:$0xff]  ;;  %v177_v42 = vld [vmem:[#allocation8 + $0x30] sm:$0xff]  ;;  %v176_v43 = vld [vmem:[#allocation8 + $0x28] sm:$0xff] }
  0x22   :  { %116 = vmatpush.msra.mxu0 %v97_v12  ;;  %v175_v44 = vld [vmem:[#allocation8 + $0x20] sm:$0xff]  ;;  %v174_v45 = vld [vmem:[#allocation8 + $0x18] sm:$0xff]  ;;  %v173_v50 = vld [vmem:[#allocation8 + $0x10] sm:$0xff] }
  0x23   :  { %157 = vmatpush.msra.mxu1 %v138_v17  ;;  %193 = vmatpush.msra.mxu2 %v184_v35  ;;  %v258_v46 = vld [vmem:[%s466_s2] ss:$0 sm:$0xff]  ;;  %v172_v51 = vld [vmem:[#allocation8 + $0x8] sm:$0xff]  ;;  %v171_v52 = vld [vmem:[#allocation8] sm:$0xff] }
  0x24   :  { %117 = vmatpush.msra.mxu0 %v96_v14  ;;  %v259_v53 = vld [vmem:[%s468_s4] ss:$0 sm:$0xff]  ;;  %s399_s4 = smov [#allocation10]  }
  0x25   :  { %158 = vmatpush.msra.mxu1 %v137_v19  ;;  %194 = vmatpush.msra.mxu2 %v183_v36  ;;  %v260_v57 = vld [vmem:[%s470_s6] ss:$0 sm:$0xff]  ;;  %s236_s24 = sshll.u32 %s399_s4, 4  ;;  %s238_s6 = sshll.u32 %s471_s7, 4  ;;  %s237_s24 = int_to_ptr.vmem [resolvable:$true] %s236_s24  ;;  %s239_s6 = int_to_ptr.hbm [resolvable:$true] %s238_s6 }
  0x26   :  { %118 = vmatpush.msra.mxu0 %v95_v16 }
  0x27   :  { %159 = vmatpush.msra.mxu1 %v136_v21  ;;  %195 = vmatpush.msra.mxu2 %v182_v37 }
  0x28   :  { %119 = vmatpush.msra.mxu0 %v94_v18 }
  0x29   :  { %160 = vmatpush.msra.mxu1 %v135_v23  ;;  %196 = vmatpush.msra.mxu2 %v181_v38 }
  0x2a   :  { %120 = vmatpush.msra.mxu0 %v93_v20 }
  0x2b   :  { %161 = vmatpush.msra.mxu1 %v134_v25  ;;  %197 = vmatpush.msra.mxu2 %v180_v39 }
  0x2c   :  { %121 = vmatpush.msra.mxu0 %v92_v22 }
  0x2d   :  { %162 = vmatpush.msra.mxu1 %v133_v27  ;;  %198 = vmatpush.msra.mxu2 %v179_v40 }
  0x2e   :  { %122 = vmatpush.msra.mxu0 %v91_v24 }
  0x2f   :  { %163 = vmatpush.msra.mxu1 %v132_v30  ;;  %199 = vmatpush.msra.mxu2 %v178_v41 }
  0x30   :  { %123 = vmatpush.msra.mxu0 %v90_v26 }
  0x31   :  { %164 = vmatpush.msra.mxu1 %v131_v31  ;;  %200 = vmatpush.msra.mxu2 %v177_v42 }
  0x32   :  { %124 = vmatpush.msra.mxu0 %v89_v28 }
  0x33   :  { %125 = vmatmul.f32.vlgmr.msra.gmra.mxu0 %v88_v29  ;;  %165 = vmatpush.msra.mxu1 %v130_v32 }
  0x34   :  { %201 = vmatpush.msra.mxu2 %v176_v43 }
  0x36   :  { %202 = vmatpush.msra.mxu2 %v175_v44 }
  0x38   :  { %203 = vmatpush.msra.mxu2 %v174_v45 }
  0x3a   :  { %204 = vmatpush.msra.mxu2 %v173_v50 }
  0x3c   :  { %205 = vmatpush.msra.mxu2 %v172_v51 }
  0x3e   :  { %206 = vmatpush.msra.mxu2 %v171_v52 }
  0xb0   :  { %v126_v47 = vpop.f32.mrf.mxu0 }
  0xb1   :  { %v127_v48 = vadd.f32 %v258_v46, %v126_v47 }
  0xb3   :  { %v129_v49 = vmax.f32 %v127_v48, 0.0 }
  0xb5   :  { %166 = vmatmul.f32.vlgmr.msra.gmra.mxu1 %v129_v49 }
 0x132   :  { %v167_v54 = vpop.f32.mrf.mxu1 }
 0x133   :  { %v168_v55 = vadd.f32 %v259_v53, %v167_v54 }
 0x135   :  { %v170_v56 = vmax.f32 %v168_v55, 0.0 }
 0x137   :  { %207 = vmatmul.f32.vlgmr.msra.gmra.mxu2 %v170_v56 }
 0x1ba   :  { %v208_v58 = vpop.f32.mrf.mxu2 }
 0x1bb   :  { %v209_v59 = vadd.f32 %v260_v57, %v208_v58 }
 0x1bd   :  { %v250_v60 = vmul.f32 -1.442695, %v209_v59 }
 0x1bf   :  { %261 = vpow2.f32 %v250_v60 }
 0x1c5   :  { %v262_v61 = vpop.eup %261 }
 0x1c6   :  { %v214_v62 = vadd.f32 1.0, %v262_v61 }
 0x1c8   :  { %263 = vrcp.f32 %v214_v62  ;;  %v226_v2 = vand.u32 2147483648, %v214_v62  ;;  %v224_v4 = vand.u32 2147483647, %v214_v62  ;;  %vm220_vm1 = vweird.f32 %v214_v62 }
 0x1ca   :  { %v227_v6 = vor.u32 1.1754944e-38, %v226_v2  ;;  %vm225_vm3 = vcmp.eq.f32.partialorder %v224_v4, 8.507059e+37 }
 0x1ce   :  { %v264_v63 = vpop.eup %263 }
 0x1cf   :  { %v216_v0 = vmul.f32 %v264_v63, %v214_v62  ;;  %vm221_vm0 = vweird.f32 %v264_v63 }
 0x1d0   :  { %vm222_vm2 = vmor %vm220_vm1, %vm221_vm0 }
 0x1d1   :  { %v217_v1 = vsub.f32 1.0, %v216_v0 }
 0x1d3   :  { %v218_v3 = vmul.f32 %v264_v63, %v217_v1 }
 0x1d5   :  { %v219_v5 = vadd.f32 %v264_v63, %v218_v3 }
 0x1d7   :  { %v223_v7 = vsel %vm222_vm2, %v264_v63, %v219_v5 }
 0x1d8   :  { %v228_v8 = vsel %vm225_vm3, %v227_v6, %v223_v7 }
 0x1d9   :  { %230 = vst [vmem:[#allocation10] sm:$0xff] %v228_v8 }
 0x1da   :  { %241 = dma.vmem_to_hbm [thread:$0]  %s237_s24, 128, %s239_s6, [#allocation4]  }
 0x1db   :  { %391 = dma.done.wait [#allocation4], 128  }
 0x1dc   :  { %392 = vsyncadd [#allocation4], 4294967168 }
 0x1dd   :  { %246 = vsyncpa [#allocation3], 1 }
 0x1de   :  { %247 = vsyncpa [#allocation6], 1 }
 0x1df   :  { %248 = vsyncpa [#allocation9], 1 }
 0x1e0   :  { %249 = vsyncpa [#allocation4], 1 }

</bundles_post_ra>
